<compile_context>
chip_gen: v6e
topology: v6e:2x2x1
jax: 0.10.0
libtpu: 0.0.40
codegen_flags: <defaults>
</compile_context>

<pallas_src>
import jax
import jax.numpy as jnp
from jax.experimental import pallas as pl
from jax.experimental.pallas import tpu as pltpu

_TARGET = 0.0129632


def _neighborhood_partial_kernel(x_ref, o_ref):
    """One independent grid step: per-column partial sums of adjacent diffs.

    x_ref: (tile_b, N) input rows (native dtype).
    o_ref: (1, 1, N) f32 per-column partial sums for this block.
           Column j >= 1 holds sum_b |x[b, j] - x[b, j-1]|; column 0 holds the
           wrap-around term |x[b, 0] - x[b, N-1]|, dropped by the wrapper.
    """
    x_raw = x_ref[...]
    # Non-negative shift (Mosaic requirement): rolled[:, j] = x[:, (j - 1) % N].
    # Roll before the f32 cast so packed bf16 inputs halve XLU traffic.
    rolled_raw = pltpu.roll(x_raw, shift=1, axis=1)
    x = x_raw.astype(jnp.float32)
    rolled = rolled_raw.astype(jnp.float32)
    d = jnp.abs(x - rolled)                              # VPU, f32
    # Sublane-only reduce (XLU slot, hidden under the HBM DMA); keeps the
    # per-block output lane-dense and the epilogue tiny.
    o_ref[0] = jnp.sum(d, axis=0, keepdims=True)


def _vmem_limit_bytes():
    """Generation-aware scoped-VMEM limit with headroom for compiler scratch."""
    try:
        phys = pltpu.get_tpu_info().vmem_capacity_bytes
    except Exception:
        phys = 64 << 20
    # v5e/v6e (128 MiB physical) -> 64 MiB; v7x (64 MiB physical) -> 48 MiB.
    return min(64 << 20, (phys // 4) * 3)


def _choose_tile_b(B, N, itemsize, vmem_limit):
    """Largest multiple-of-8 batch tile fitting the per-block VMEM budget.

    Per-row footprint: double-buffered input rows plus ~3 f32 work copies
    (cast / roll / diff) that materialize in VMEM for multi-MiB tiles.
    """
    bytes_per_row = 2 * N * itemsize + 3 * N * 4
    budget = max(1, vmem_limit - (4 << 20))              # keep a little slack
    max_rows = max(8, (budget // bytes_per_row) // 8 * 8)
    b_rounded = ((B + 7) // 8) * 8
    return int(min(b_rounded, max_rows))


def neighborhood_loss(x):
    """x: (B, N) float array. Returns scalar f32 loss matching the PyTorch module."""
    B, N = x.shape
    itemsize = jnp.dtype(x.dtype).itemsize
    vmem_limit = _vmem_limit_bytes()
    tile_b = _choose_tile_b(B, N, itemsize, vmem_limit)

    # Pad the batch with zero rows so every grid block is full; zero rows
    # contribute |0 - 0| = 0 to every column (including the wrap column).
    grid_b = pl.cdiv(B, tile_b)
    b_pad = grid_b * tile_b
    if b_pad != B:
        x = jnp.pad(x, ((0, b_pad - B), (0, 0)))

    partials = pl.pallas_call(
        _neighborhood_partial_kernel,
        out_shape=jax.ShapeDtypeStruct((grid_b, 1, N), jnp.float32),
        grid_spec=pltpu.PrefetchScalarGridSpec(
            num_scalar_prefetch=0,
            grid=(grid_b,),
            in_specs=[pl.BlockSpec((tile_b, N), lambda i: (i, 0))],
            out_specs=pl.BlockSpec((1, 1, N), lambda i: (i, 0, 0)),
        ),
        compiler_params=pltpu.CompilerParams(
            # Independent per-block partial sums -> batch axis can be split
            # across TensorCores (v7x); harmless on single-TC v5e/v6e.
            dimension_semantics=("parallel",),
            vmem_limit_bytes=vmem_limit,
        ),
        cost_estimate=pl.CostEstimate(
            flops=3 * b_pad * N,
            transcendentals=0,
            bytes_accessed=b_pad * N * itemsize + grid_b * N * 4,
        ),
    )(x)

    # Tiny plain-JAX epilogue: drop the wrap column (j == 0), mean, |.-target|.
    col_sums = jnp.sum(partials, axis=(0, 1))            # (N,)
    total = jnp.sum(col_sums[1:])
    denom = jnp.float32(B * (N - 1))
    return jnp.abs(total / denom - jnp.float32(_TARGET))


def neighborhood_loss_ref(x):
    x = x.astype(jnp.float32)
    d = jnp.abs(x[:, 1:] - x[:, :-1])
    return jnp.abs(jnp.mean(d) - jnp.float32(_TARGET))


if __name__ == "__main__":
    key = jax.random.PRNGKey(0)

    # Main check: B multiple of 8.
    B, N = 16, 256
    x = jax.random.normal(key, (B, N), dtype=jnp.float32) * 0.05
    out = jax.block_until_ready(neighborhood_loss(x))
    ref = neighborhood_loss_ref(x)
    assert jnp.allclose(out, ref, atol=1e-5, rtol=1e-5), (out, ref)

    # Padding path: batch not a multiple of 8.
    x2 = jax.random.normal(jax.random.PRNGKey(1), (10, 256), dtype=jnp.float32) * 0.05
    out2 = jax.block_until_ready(neighborhood_loss(x2))
    ref2 = neighborhood_loss_ref(x2)
    assert jnp.allclose(out2, ref2, atol=1e-5, rtol=1e-5), (out2, ref2)

    print("KERNEL_OK")
</pallas_src>

<mosaic_0001>
module attributes {stable_mosaic.version = 11 : i64} {
  func.func @_neighborhood_partial_kernel(%arg0: i32, %arg1: memref<16x256xf32, #tpu.memory_space<vmem>>, %arg2: memref<1x1x256xf32, #tpu.memory_space<vmem>>) attributes {dimension_semantics = [#tpu.dimension_semantics<parallel>], iteration_bounds = array<i64: 1>, scalar_prefetch = 0 : i64, scratch_operands = 0 : i64, tpu.core_type = #tpu.core_type<tc>, window_params = [{transform_indices = @transform_0, window_bounds = array<i64: 16, 256>}, {transform_indices = @transform_1, window_bounds = array<i64: 1, 1, 256>}]} {
    %c0 = arith.constant 0 : index
    %c0_0 = arith.constant 0 : index
    %0 = vector.load %arg1[%c0, %c0_0] : memref<16x256xf32, #tpu.memory_space<vmem>>, vector<16x256xf32>
    %c1_i32 = arith.constant 1 : i32
    %1 = tpu.dynamic_rotate %0 by %c1_i32 dim 1 : vector<16x256xf32>, i32 -> vector<16x256xf32>
    %2 = arith.subf %0, %1 : vector<16x256xf32>
    %3 = math.absf %2 : vector<16x256xf32>
    %cst = arith.constant dense<0.000000e+00> : vector<256xf32>
    %4 = vector.multi_reduction <add>, %3, %cst [0] : vector<16x256xf32> to vector<256xf32>
    %5 = vector.shape_cast %4 : vector<256xf32> to vector<1x256xf32>
    %c0_1 = arith.constant 0 : index
    %c0_2 = arith.constant 0 : index
    %c0_3 = arith.constant 0 : index
    %6 = vector.load %arg2[%c0_1, %c0_2, %c0_3] : memref<1x1x256xf32, #tpu.memory_space<vmem>>, vector<1x1x256xf32>
    %7 = vector.shape_cast %6 : vector<1x1x256xf32> to vector<1x256xf32>
    %8 = vector.shape_cast %5 : vector<1x256xf32> to vector<1x1x256xf32>
    tpu.vector_store %arg2[%c0_1, %c0_2, %c0_3], %8 {strides = array<i32>} : memref<1x1x256xf32, #tpu.memory_space<vmem>>, vector<1x1x256xf32>,
    return
  }
  func.func @transform_0(%arg0: i32) -> (i32, i32) {
    %c0_i32 = arith.constant 0 : i32
    %c0_i32_0 = arith.constant 0 : i32
    return %arg0, %c0_i32 : i32, i32
  }
  func.func @transform_1(%arg0: i32) -> (i32, i32, i32) {
    %c0_i32 = arith.constant 0 : i32
    %c0_i32_0 = arith.constant 0 : i32
    %c0_i32_1 = arith.constant 0 : i32
    return %arg0, %c0_i32, %c0_i32_0 : i32, i32, i32
  }
}

</mosaic_0001>

<bundles_post_ra>
// kernel: tpu_custom_call.1
= control target key start
LH: loop header
LB: loop body
LE: loop exit
PB: predicated region body
PF: predicated region fallthrough
CT: control target
= control target key end

     0   :  { %6 = vsyncpa [#allocation3], 0  ;;  %s174_s0 = inlined_call_operand.hbm [shape: f32[16,256], index: 0, kind: input, shape index: {}]   ;;  %s175_s1 = inlined_call_operand.hbm [shape: f32[1,1,256], index: 1, kind: output, shape index: {}]  }
   0x1   :  { %7 = vsyncpa [#allocation4], 0  ;;  %s152_s6 = smov [#allocation2]  }
   0x2   :  { %s13_s7 = sshll.u32 %s152_s6, 4  ;;  %s14_s7 = int_to_ptr.vmem [resolvable:$true] %s13_s7 }
   0x3   :  { %s116_s8 = scalar_lea.vmem %s14_s7, 512  ;;  %p121_p1 = scmp.lt.s32.totalorder %s14_s7, %s14_s7 }
   0x4   :  { %p117_p0 = scmp.ne.s32.totalorder %s14_s7, %s116_s8  ;;  %p122_p2 = scmp.lt.s32.totalorder %s116_s8, %s116_s8 }
   0x6   :  { %p123_p3 = por %p122_p2, %p121_p1 }
   0x8   :  { %p124_p4 = pnand %p123_p3, %p117_p0 }
   0xa   :  { %127 = shalt.err (!%p124_p4)
}
   0xb   :  { %s153_s9 = smov 256   ;;  %s154_s10 = smov 16  }
   0xc   :  { %19 = dma.hbm_to_vmem [thread:$0]  %s174_s0, 512, %s14_s7, [#allocation3], %s153_s9, %s153_s9, %s154_s10  }
   0xd   :  { %148 = dma.done.wait [#allocation3], 512  }
   0xe   :  { %149 = vsyncadd [#allocation3], 4294966784  ;;  %v24_v0 = vld [vmem:[#allocation2 + $0x8] sm:$0xff]  ;;  %v23_v1 = vld [vmem:[#allocation2] sm:$0xff]  ;;  %s155_s13 = smov 1   ;;  %v35_v4 = vlaneseq  ;;  %s157_s0 = smov [#allocation5]  }
   0xf   :  { %31 = vrot.lane.b32.xlu1 %v24_v0, %s155_s13  ;;  %27 = vrot.lane.b32.xlu0 %v23_v1, %s155_s13  ;;  %v26_v2 = vld [vmem:[#allocation2 + $0x18] sm:$0xff]  ;;  %v25_v3 = vld [vmem:[#allocation2 + $0x10] sm:$0xff]  ;;  %v156_v28 = vmov 1966171168   ;;  %s93_s14 = sshll.u32 %s157_s0, 4  ;;  %s94_s14 = int_to_ptr.vmem [resolvable:$true] %s93_s14 }
  0x10   :  { %v36_v5 = vand.u32 127, %v35_v4  ;;  %v68_v29 = vunpack.c.l.s4 %v156_v28  ;;  %v71_v35 = vshrl.u32 %v35_v4, 7  ;;  %vm84_vm1 = vcmp.lt.s32.totalorder %v35_v4, 256  ;;  %s128_s15 = scalar_lea.vmem %s94_s14, 32  ;;  %p133_p6 = scmp.lt.s32.totalorder %s94_s14, %s94_s14 }
  0x11   :  { %p129_p5 = scmp.ne.s32.totalorder %s94_s14, %s128_s15  ;;  %p134_p7 = scmp.lt.s32.totalorder %s128_s15, %s128_s15 }
  0x12   :  { %vm37_vm0 = vcmp.lt.s32.totalorder %v36_v5, 1  ;;  %v69_v34 = vunpack.c.0.s8 %v68_v29 }
  0x13   :  { %33 = vrot.lane.b32.xlu1 %v26_v2, %s155_s13  ;;  %29 = vrot.lane.b32.xlu0 %v25_v3, %s155_s13  ;;  %p135_p8 = por %p134_p7, %p133_p6 }
  0x14   :  { %v72_v40 = vsub.s32 %v69_v34, %v71_v35 }
  0x15   :  { %p136_p9 = pnand %p135_p8, %p129_p5 }
  0x81   :  { %v32_v6 = vpop.permute.xlu1 %31  ;;  %v28_v7 = vpop.permute.xlu0 %27 }
  0x82   :  { %v38_v8 = vsel %vm37_vm0, %v28_v7, %v32_v6  ;;  %v40_v9 = vsel %vm37_vm0, %v32_v6, %v28_v7 }
  0x83   :  { %v42_v10 = vsub.f32 %v23_v1, %v40_v9  ;;  %v43_v11 = vsub.f32 %v24_v0, %v38_v8 }
  0x85   :  { %v34_v12 = vpop.permute.xlu1 %33  ;;  %v30_v13 = vpop.permute.xlu0 %29  ;;  %v46_v18 = vand.u32 2147483647, %v42_v10  ;;  %v47_v19 = vand.u32 2147483647, %v43_v11 }
  0x86   :  { %v39_v14 = vsel %vm37_vm0, %v30_v13, %v34_v12  ;;  %v41_v15 = vsel %vm37_vm0, %v34_v12, %v30_v13 }
  0x87   :  { %v44_v16 = vsub.f32 %v25_v3, %v41_v15  ;;  %v45_v17 = vsub.f32 %v26_v2, %v39_v14 }
  0x89   :  { %v48_v20 = vand.u32 2147483647, %v44_v16  ;;  %v49_v21 = vand.u32 2147483647, %v45_v17 }
  0x8b   :  { %v50_v22 = vadd.f32 %v48_v20, %v46_v18  ;;  %v57_v23 = vadd.f32 %v49_v21, %v47_v19 }
  0x8d   :  { %v51_v24 = vrot.slane %v50_v22, 4  ;;  %v58_v25 = vrot.slane %v57_v23, 4 }
  0x8f   :  { %v52_v26 = vadd.f32 %v51_v24, %v50_v22  ;;  %v59_v27 = vadd.f32 %v58_v25, %v57_v23 }
  0x91   :  { %v53_v30 = vrot.slane %v52_v26, 2  ;;  %v60_v31 = vrot.slane %v59_v27, 2 }
  0x93   :  { %v54_v32 = vadd.f32 %v53_v30, %v52_v26  ;;  %v61_v33 = vadd.f32 %v60_v31, %v59_v27 }
  0x95   :  { %v55_v36 = vrot.slane %v54_v32, 1  ;;  %v62_v37 = vrot.slane %v61_v33, 1 }
  0x97   :  { %v56_v38 = vadd.f32 %v55_v36, %v54_v32  ;;  %v63_v39 = vadd.f32 %v62_v37, %v61_v33 }
  0x99   :  { %v66_v41 = vcombine.low %v56_v38, %v63_v39 }
  0x9b   :  { %v73_v42 = vrot.slane %v66_v41, %v72_v40 }
  0x9d   :  { %v80_v43 = vrot.slane %v73_v42, %v72_v40 }
  0x9f   :  { %86 = vst.msk [vmem:[#allocation5] sm:$0x3] %vm84_vm1, %v80_v43 }
  0xa0   :  { %139 = shalt.err (!%p136_p9)
}
  0xa1   :  { %96 = dma.vmem_to_hbm [thread:$0]  %s94_s14, 32, %s175_s1, [#allocation4]  }
  0xa2   :  { %150 = dma.done.wait [#allocation4], 32  }
  0xa3   :  { %151 = vsyncadd [#allocation4], 4294967264 }
  0xa4   :  { %100 = vsyncpa [#allocation3], 1 }
  0xa5   :  { %101 = vsyncpa [#allocation4], 1 }

</bundles_post_ra>
